<compile_context>
chip_gen: v6e
topology: v6e:2x2x1
jax: 0.10.0
libtpu: 0.0.40
codegen_flags: <defaults>
</compile_context>

<pallas_src>
import functools

import jax
import jax.numpy as jnp
from jax.experimental import pallas as pl
from jax.experimental.pallas import tpu as pltpu

_LANES = 128
_SUBLANES = 8


def _round_up(n: int, m: int) -> int:
    return ((n + m - 1) // m) * m


def _cdiv(a: int, b: int) -> int:
    return (a + b - 1) // b


def _linear_kernel(x_ref, w_ref, b_ref, o_ref, acc_ref, *, d_total, d_tile, ragged_d):
    # x_ref  : (tb, td) VMEM   -- streamed batch x feature tile
    # w_ref  : (1, td)  VMEM   -- lane-dense weight slice
    # b_ref  : (1,)     SMEM   -- bias scalar
    # o_ref  : (tb, 1)  VMEM   -- per-row result (sublane axis; no relayout)
    # acc_ref: (tb, 1)  VMEM   -- fp32 accumulator over the D grid axis
    k = pl.program_id(1)

    @pl.when(k == 0)
    def _():
        acc_ref[...] = jnp.zeros_like(acc_ref)

    prod = x_ref[...].astype(jnp.float32) * w_ref[...].astype(jnp.float32)
    if ragged_d:
        # Zero out the garbage columns of the ragged last D tile.
        col = jax.lax.broadcasted_iota(jnp.int32, prod.shape, 1) + k * d_tile
        prod = jnp.where(col < d_total, prod, 0.0)
    acc_ref[...] += jnp.sum(prod, axis=-1, keepdims=True)

    @pl.when(k == pl.num_programs(1) - 1)
    def _():
        o_ref[...] = (acc_ref[...] + b_ref[0]).astype(o_ref.dtype)


def mlp_forward(x, weight, bias, *, max_tile_bytes=8 * 1024 * 1024):
    """x: (B, D); weight: (1, D) (PyTorch Linear layout); bias: (1,). Returns (B, 1)."""
    B, D = x.shape
    w_row = weight.reshape(1, D)
    b1 = bias.reshape(1).astype(jnp.float32)
    itemsize = jnp.dtype(x.dtype).itemsize

    # ---- Feature (D) tiling: only when even an 8-row tile at full D exceeds
    # the per-tile budget (very large D); otherwise keep D whole (no masking).
    if _SUBLANES * D * itemsize <= max_tile_bytes:
        td = D
    else:
        td = max(_LANES,
                 (max_tile_bytes // (_LANES * itemsize)) // _LANES * _LANES)
    n_d = _cdiv(D, td)
    ragged_d = (n_d > 1) and (D % td != 0)

    # ---- Batch tiling: biggest tile (multiple of 8 sublanes) under the budget.
    b_r = _round_up(B, _SUBLANES)
    rows_cap = max(_SUBLANES,
                   (max_tile_bytes // (td * itemsize)) // _SUBLANES * _SUBLANES)
    tb = min(rows_cap, b_r)
    n_b = _cdiv(B, tb)
    # v7x megacore: batch axis is "parallel" -> use >= 2 tiles when batch allows,
    # otherwise one TensorCore sits idle.
    if n_b == 1 and b_r > _SUBLANES:
        tb = _round_up(_cdiv(b_r, 2), _SUBLANES)
        n_b = _cdiv(B, tb)

    # ---- Explicit VMEM budget (v5e scoped-VMEM default is only 16 MiB).
    vmem_need = (2 * tb * td * itemsize      # double-buffered x tiles
                 + 2 * td * itemsize         # weight slice (double-buffered)
                 + 2 * tb * itemsize         # output tile
                 + tb * 4                    # fp32 accumulator scratch
                 + (1 << 20))                # headroom
    vmem_limit = int(min(64 * 1024 * 1024, max(vmem_need, 16 * 1024 * 1024)))

    kernel = functools.partial(
        _linear_kernel, d_total=D, d_tile=td, ragged_d=ragged_d)

    # TODO(synk): for D < 128 only D of 128 lanes per vreg are live; a packed
    # (B*D//128, 128) layout + segmented (strided-roll) reduce would recover
    # the HBM roofline for tiny feature counts.
    return pl.pallas_call(
        kernel,
        out_shape=jax.ShapeDtypeStruct((B, 1), x.dtype),
        grid=(n_b, n_d),
        in_specs=[
            pl.BlockSpec((tb, td), lambda i, k: (i, k)),           # x tiles
            pl.BlockSpec((1, td), lambda i, k: (0, k)),            # weight slice
            pl.BlockSpec(memory_space=pltpu.MemorySpace.SMEM),     # bias scalar
        ],
        out_specs=pl.BlockSpec((tb, 1), lambda i, k: (i, 0)),
        scratch_shapes=[pltpu.VMEM((tb, 1), jnp.float32)],
        compiler_params=pltpu.CompilerParams(
            dimension_semantics=("parallel", "arbitrary"),
            vmem_limit_bytes=vmem_limit),
    )(x, w_row, b1)


if __name__ == "__main__":
    key = jax.random.PRNGKey(0)
    kx, kw, kb = jax.random.split(key, 3)

    # Primary test: matches the module spec (nn.Linear(nb_input, 1)).
    batch, nb_input = 8, 32
    bound = 1.0 / (nb_input ** 0.5)
    weight = jax.random.uniform(kw, (1, nb_input), jnp.float32, -bound, bound)
    bias = jax.random.uniform(kb, (1,), jnp.float32, -bound, bound)
    x = jax.random.normal(kx, (batch, nb_input), jnp.float32)

    out = jax.block_until_ready(mlp_forward(x, weight, bias))
    ref = x @ weight.T + bias
    assert out.shape == (batch, 1)
    assert jnp.allclose(out, ref, atol=1e-5, rtol=1e-5)

    # Secondary test: exercises ragged batch, D tiling + ragged-D masking and
    # the multi-tile / accumulator path (small max_tile_bytes forces tiling).
    k2x, k2w, k2b = jax.random.split(jax.random.PRNGKey(1), 3)
    B2, D2 = 100, 320
    w2 = jax.random.uniform(k2w, (1, D2), jnp.float32, -0.05, 0.05)
    b2 = jax.random.uniform(k2b, (1,), jnp.float32, -0.05, 0.05)
    x2 = jax.random.normal(k2x, (B2, D2), jnp.float32)
    out2 = jax.block_until_ready(mlp_forward(x2, w2, b2, max_tile_bytes=8192))
    ref2 = x2 @ w2.T + b2
    assert out2.shape == (B2, 1)
    assert jnp.allclose(out2, ref2, atol=1e-4, rtol=1e-5)

    print("KERNEL_OK")
</pallas_src>

<mosaic_0001>
module attributes {stable_mosaic.version = 11 : i64} {
  func.func @_linear_kernel(%arg0: i32, %arg1: i32, %arg2: memref<8x32xf32, #tpu.memory_space<vmem>>, %arg3: memref<1x32xf32, #tpu.memory_space<vmem>>, %arg4: memref<1xf32, #tpu.memory_space<smem>>, %arg5: memref<8x1xf32, #tpu.memory_space<vmem>>, %arg6: memref<8x1xf32, #tpu.memory_space<vmem>>) attributes {dimension_semantics = [#tpu.dimension_semantics<parallel>, #tpu.dimension_semantics<arbitrary>], iteration_bounds = array<i64: 1, 1>, scalar_prefetch = 0 : i64, scratch_operands = 1 : i64, tpu.core_type = #tpu.core_type<tc>, window_params = [{transform_indices = @transform_0, window_bounds = array<i64: 8, 32>}, {transform_indices = @transform_1, window_bounds = array<i64: 1, 32>}, {transform_indices = @transform_2, window_bounds = array<i64: 1>}, {transform_indices = @transform_3, window_bounds = array<i64: 8, 1>}]} {
    %c0_i32 = arith.constant 0 : i32
    %0 = arith.cmpi eq, %arg1, %c0_i32 : i32
    %1 = arith.extui %0 : i1 to i32
    %c0_i32_0 = arith.constant 0 : i32
    %2 = arith.cmpi ne, %1, %c0_i32_0 : i32
    scf.if %2 {
      %cst_10 = arith.constant 0.000000e+00 : f32
      %15 = vector.broadcast %cst_10 : f32 to vector<8x1xf32>
      %c0_11 = arith.constant 0 : index
      %c0_12 = arith.constant 0 : index
      %16 = vector.load %arg6[%c0_11, %c0_12] : memref<8x1xf32, #tpu.memory_space<vmem>>, vector<8x1xf32>
      tpu.vector_store %arg6[%c0_11, %c0_12], %15 {strides = array<i32>} : memref<8x1xf32, #tpu.memory_space<vmem>>, vector<8x1xf32>,
    } else {
    }
    %c0 = arith.constant 0 : index
    %c0_1 = arith.constant 0 : index
    %3 = vector.load %arg2[%c0, %c0_1] : memref<8x32xf32, #tpu.memory_space<vmem>>, vector<8x32xf32>
    %c0_2 = arith.constant 0 : index
    %c0_3 = arith.constant 0 : index
    %4 = vector.load %arg3[%c0_2, %c0_3] : memref<1x32xf32, #tpu.memory_space<vmem>>, vector<1x32xf32>
    %5 = vector.broadcast %4 : vector<1x32xf32> to vector<8x32xf32>
    %6 = arith.mulf %3, %5 : vector<8x32xf32>
    %c0_4 = arith.constant 0 : index
    %c0_5 = arith.constant 0 : index
    %7 = vector.load %arg6[%c0_4, %c0_5] : memref<8x1xf32, #tpu.memory_space<vmem>>, vector<8x1xf32>
    %cst = arith.constant dense<0.000000e+00> : vector<8xf32>
    %8 = vector.multi_reduction <add>, %6, %cst [1] : vector<8x32xf32> to vector<8xf32>
    %9 = vector.shape_cast %8 : vector<8xf32> to vector<8x1xf32>
    %10 = arith.addf %7, %9 : vector<8x1xf32>
    %c0_6 = arith.constant 0 : index
    %c0_7 = arith.constant 0 : index
    %11 = vector.load %arg6[%c0_6, %c0_7] : memref<8x1xf32, #tpu.memory_space<vmem>>, vector<8x1xf32>
    tpu.vector_store %arg6[%c0_6, %c0_7], %10 {strides = array<i32>} : memref<8x1xf32, #tpu.memory_space<vmem>>, vector<8x1xf32>,
    %c0_i32_8 = arith.constant 0 : i32
    %12 = arith.cmpi eq, %arg1, %c0_i32_8 : i32
    %13 = arith.extui %12 : i1 to i32
    %c0_i32_9 = arith.constant 0 : i32
    %14 = arith.cmpi ne, %13, %c0_i32_9 : i32
    scf.if %14 {
      %c0_10 = arith.constant 0 : index
      %c0_11 = arith.constant 0 : index
      %15 = vector.load %arg6[%c0_10, %c0_11] : memref<8x1xf32, #tpu.memory_space<vmem>>, vector<8x1xf32>
      %c0_12 = arith.constant 0 : index
      %16 = memref.load %arg4[%c0_12] : memref<1xf32, #tpu.memory_space<smem>>
      %17 = vector.broadcast %16 : f32 to vector<8x1xf32>
      %18 = arith.addf %15, %17 : vector<8x1xf32>
      %c0_13 = arith.constant 0 : index
      %c0_14 = arith.constant 0 : index
      %19 = vector.load %arg5[%c0_13, %c0_14] : memref<8x1xf32, #tpu.memory_space<vmem>>, vector<8x1xf32>
      tpu.vector_store %arg5[%c0_13, %c0_14], %18 {strides = array<i32>} : memref<8x1xf32, #tpu.memory_space<vmem>>, vector<8x1xf32>,
    } else {
    }
    return
  }
  func.func @transform_0(%arg0: i32, %arg1: i32) -> (i32, i32) {
    %c0_i32 = arith.constant 0 : i32
    return %arg0, %arg1 : i32, i32
  }
  func.func @transform_1(%arg0: i32, %arg1: i32) -> (i32, i32) {
    %c0_i32 = arith.constant 0 : i32
    %c0_i32_0 = arith.constant 0 : i32
    return %c0_i32, %arg1 : i32, i32
  }
  func.func @transform_2(%arg0: i32, %arg1: i32) -> i32 {
    %c0_i32 = arith.constant 0 : i32
    %c0_i32_0 = arith.constant 0 : i32
    return %c0_i32 : i32
  }
  func.func @transform_3(%arg0: i32, %arg1: i32) -> (i32, i32) {
    %c0_i32 = arith.constant 0 : i32
    %c0_i32_0 = arith.constant 0 : i32
    return %arg0, %c0_i32 : i32, i32
  }
}

</mosaic_0001>

<bundles_post_ra>
// kernel: tpu_custom_call.1
= control target key start
LH: loop header
LB: loop body
LE: loop exit
PB: predicated region body
PF: predicated region fallthrough
CT: control target
= control target key end

     0   :  { %9 = vsyncpa [#allocation5], 0  ;;  %s88_s12 = smov [#allocation4]   ;;  %s125_s0 = inlined_call_operand.hbm [shape: f32[8,32], index: 0, kind: input, shape index: {}]   ;;  %s126_s1 = inlined_call_operand.vmem [shape: f32[1,32], index: 1, kind: input, shape index: {}]   ;;  %s127_s2 = inlined_call_operand.<no memory space> [shape: f32[1], index: 2, kind: input, shape index: {}]   ;;  %s128_s3 = inlined_call_operand.vmem [shape: f32[8,1], index: 3, kind: output, shape index: {}]  }
   0x1   :  { %s16_s13 = sshll.u32 %s88_s12, 4  ;;  %s17_s13 = int_to_ptr.vmem [resolvable:$true] %s16_s13 }
   0x2   :  { %s74_s14 = scalar_lea.vmem %s17_s13, 128  ;;  %p79_p1 = scmp.lt.s32.totalorder %s17_s13, %s17_s13 }
   0x3   :  { %p75_p0 = scmp.ne.s32.totalorder %s17_s13, %s74_s14  ;;  %p80_p2 = scmp.lt.s32.totalorder %s74_s14, %s74_s14 }
   0x5   :  { %p81_p3 = por %p80_p2, %p79_p1 }
   0x7   :  { %p82_p4 = pnand %p81_p3, %p75_p0 }
   0x9   :  { %85 = shalt.err (!%p82_p4)
}
   0xa   :  { %19 = dma.hbm_to_vmem [thread:$0]  %s125_s0, 128, %s17_s13, [#allocation5]  }
   0xb   :  { %86 = dma.done.wait [#allocation5], 128  }
   0xc   :  { %87 = vsyncadd [#allocation5], 4294967168  ;;  %vm31_vm0 = vcmask 7168   ;;  %v89_v0 = vmov 0.0   ;;  %v33_v1 = vld [vmem:[#allocation4] sm:$0xff]  ;;  %vm43_vm1 = vcmask 261120   ;;  %v55_v8 = vstv %s127_s2 }
   0xd   :  { %32 = vst.msk [vmem:[#allocation2] sm:$0xff] %vm31_vm0, %v89_v0  ;;  %v63_v2 = vld [vmem:[%s126_s1] ss:$0 sm:$0xff] }
   0xe   :  { %v41_v3 = vmul.f32 %v63_v2, %v33_v1 }
  0x10   :  { %v44_v4 = vsel %vm43_vm1, %v41_v3, 0.0 }
  0x11   :  { %45 = vadd.xlane.f32.xlu0 %v44_v4 }
  0x14   :  { %v42_v5 = vld [vmem:[#allocation2] sm:$0xff] }
  0x9a   :  { %v46_v6 = vpop.xlane.xlu0 %45 }
  0x9b   :  { %v47_v7 = vadd.f32 %v46_v6, %v42_v5 }
  0x9d   :  { %49 = vst.msk [vmem:[#allocation2] sm:$0xff] %vm31_vm0, %v47_v7 }
  0xa4   :  { %v53_v9 = vld [vmem:[#allocation2] sm:$0xff] }
  0xa5   :  { %v56_v10 = vadd.f32 %v55_v8, %v53_v9 }
  0xa7   :  { %57 = vst.msk [vmem:[%s128_s3] sm:$0xff] %vm31_vm0, %v56_v10 }
  0xa8   :  { %62 = vsyncpa [#allocation5], 1 }

</bundles_post_ra>
